<compile_context>
chip_gen: v7x
topology: tpu7x:2x2x1
jax: 0.10.0
libtpu: 0.0.40
codegen_flags: <defaults>
</compile_context>

<pallas_src>
import functools

import jax
import jax.numpy as jnp
from jax import lax
from jax.experimental import pallas as pl
from jax.experimental.pallas import tpu as pltpu


def _pow_factor(one_minus_pt, gamma):
    if float(gamma) == float(int(gamma)):
        # integer gamma -> lax.integer_pow (plain VPU multiplies)
        return one_minus_pt ** int(gamma)
    return one_minus_pt ** jnp.float32(gamma)


def _focal_loss_kernel_cmajor(logits_ref, targets_ref, alpha_ref, out_ref, *, gamma, n_rows):
    """Class-major layout: logits (C, Tn), targets (1, Tn), alpha (C, 1), out (1,1,1)."""
    c, tile_n = logits_ref.shape

    col = lax.broadcasted_iota(jnp.int32, (1, tile_n), 1) + pl.program_id(0) * tile_n
    valid = col < n_rows                                                   # (1, Tn)

    # neutralize garbage in the out-of-bounds columns of a partial last tile
    logits = jnp.where(valid, logits_ref[...].astype(jnp.float32), 0.0)    # (C, Tn)
    tgt = targets_ref[...]                                                 # (1, Tn) int32
    alpha_col = alpha_ref[...].astype(jnp.float32)                         # (C, 1)

    # numerically-stable log-sum-exp over the (tiny) class/sublane axis
    m = jnp.max(logits, axis=0, keepdims=True)                             # (1, Tn)
    lse = m + jnp.log(jnp.sum(jnp.exp(logits - m), axis=0, keepdims=True)) # (1, Tn)

    cls_ids = lax.broadcasted_iota(jnp.int32, (c, tile_n), 0)              # (C, Tn)
    mask = cls_ids == tgt                                                  # (C, Tn)
    logit_t = jnp.sum(jnp.where(mask, logits, 0.0), axis=0, keepdims=True)     # (1, Tn)
    alpha_t = jnp.sum(jnp.where(mask, alpha_col, 0.0), axis=0, keepdims=True)  # (1, Tn)

    ce = lse - logit_t                                                     # (1, Tn)
    pt = jnp.exp(-ce)
    one_minus_pt = jnp.maximum(1.0 - pt, 0.0)
    loss = alpha_t * _pow_factor(one_minus_pt, gamma) * ce                 # (1, Tn)
    loss = jnp.where(valid, loss, 0.0)        # mask BEFORE the partial sum

    out_ref[0] = jnp.sum(loss, axis=1, keepdims=True)                      # (1, 1) -> block (1,1,1)


def _focal_loss_kernel_rmajor(logits_ref, targets_ref, alpha_ref, out_ref, *, gamma, n_rows):
    """Row-major layout for larger C: logits (Tn, C), targets (Tn, 1), alpha (1, C)."""
    tile_n, c = logits_ref.shape

    row = lax.broadcasted_iota(jnp.int32, (tile_n, 1), 0) + pl.program_id(0) * tile_n
    valid = row < n_rows                                                   # (Tn, 1)

    logits = jnp.where(valid, logits_ref[...].astype(jnp.float32), 0.0)    # (Tn, C)
    tgt = targets_ref[...]                                                 # (Tn, 1) int32
    alpha_row = alpha_ref[...].astype(jnp.float32)                         # (1, C)

    m = jnp.max(logits, axis=-1, keepdims=True)                            # (Tn, 1)
    lse = m + jnp.log(jnp.sum(jnp.exp(logits - m), axis=-1, keepdims=True))

    cls_ids = lax.broadcasted_iota(jnp.int32, (tile_n, c), 1)
    mask = cls_ids == tgt                                                  # (Tn, C)
    logit_t = jnp.sum(jnp.where(mask, logits, 0.0), axis=-1, keepdims=True)     # (Tn, 1)
    alpha_t = jnp.sum(jnp.where(mask, alpha_row, 0.0), axis=-1, keepdims=True)  # (Tn, 1)

    ce = lse - logit_t
    pt = jnp.exp(-ce)
    one_minus_pt = jnp.maximum(1.0 - pt, 0.0)
    loss = alpha_t * _pow_factor(one_minus_pt, gamma) * ce                 # (Tn, 1)
    loss = jnp.where(valid, loss, 0.0)        # mask BEFORE the partial sum

    out_ref[0] = jnp.sum(loss, axis=0, keepdims=True)                      # (1, 1) -> block (1,1,1)


def focal_loss(logits, targets, alpha=None, gamma=2.0, tile_n=None):
    """Pallas TPU implementation of FocalLoss.forward.

    logits:  (N, C) float (any float dtype; upcast to f32 inside the kernel)
    targets: (N,)   int class indices
    alpha:   (C,)   per-class weights (defaults to ones, matching the module)
    returns: scalar float32 mean focal loss
    """
    n, c = logits.shape
    if alpha is None:
        alpha = jnp.ones((c,), dtype=jnp.float32)
    alpha = jnp.asarray(alpha, dtype=jnp.float32)
    targets = jnp.asarray(targets, dtype=jnp.int32)

    itemsize = jnp.dtype(logits.dtype).itemsize
    sublane = max(8, 32 // itemsize)            # 8 f32, 16 bf16, 32 int8/fp8
    class_major = c <= 8                        # lane-dense layout for small class counts

    compiler_params = pltpu.CompilerParams(
        dimension_semantics=("parallel",),      # v7x: both TensorCores split the row grid
        vmem_limit_bytes=48 * 1024 * 1024,
    )

    if class_major:
        # classes on sublanes, rows on lanes
        if tile_n is None:
            padded_c = ((c + sublane - 1) // sublane) * sublane
            tile_n = (1 << 20) // max(1, padded_c * itemsize)   # ~1 MiB padded logits/tile
            tile_n = max(128, min(tile_n, 32 * 1024))
        tile_n = int(tile_n)
        if tile_n >= n:
            tile_n = n                          # single full-extent block
        else:
            tile_n = max(128, (tile_n // 128) * 128)
            if tile_n >= n:
                tile_n = n

        num_tiles = pl.cdiv(n, tile_n)
        kernel = functools.partial(_focal_loss_kernel_cmajor, gamma=float(gamma), n_rows=n)

        logits_cm = logits.T                    # one-time (N,C)->(C,N) wrapper transpose
        targets_2d = targets.reshape(1, n)
        alpha_col = alpha.reshape(c, 1)

        partial = pl.pallas_call(
            kernel,
            out_shape=jax.ShapeDtypeStruct((num_tiles, 1, 1), jnp.float32),
            grid=(num_tiles,),
            in_specs=[
                pl.BlockSpec((c, tile_n), lambda i: (0, i)),     # logits (class-major)
                pl.BlockSpec((1, tile_n), lambda i: (0, i)),     # targets
                pl.BlockSpec((c, 1), lambda i: (0, 0)),          # alpha (broadcast block)
            ],
            out_specs=pl.BlockSpec((1, 1, 1), lambda i: (i, 0, 0)),
            compiler_params=compiler_params,
        )(logits_cm, targets_2d, alpha_col)
    else:
        if tile_n is None:
            padded_row_bytes = ((c + 127) // 128) * 128 * itemsize
            tile_n = (4 << 20) // max(1, padded_row_bytes)       # ~4 MiB padded logits/tile
            tile_n = max(sublane, min(tile_n, 4096))
        tile_n = int(tile_n)
        if tile_n >= n:
            tile_n = n                          # single full-extent block
        else:
            tile_n = max(sublane, (tile_n // sublane) * sublane)
            if tile_n >= n:
                tile_n = n

        num_tiles = pl.cdiv(n, tile_n)
        kernel = functools.partial(_focal_loss_kernel_rmajor, gamma=float(gamma), n_rows=n)

        targets_2d = targets.reshape(n, 1)
        alpha_row = alpha.reshape(1, c)

        partial = pl.pallas_call(
            kernel,
            out_shape=jax.ShapeDtypeStruct((num_tiles, 1, 1), jnp.float32),
            grid=(num_tiles,),
            in_specs=[
                pl.BlockSpec((tile_n, c), lambda i: (i, 0)),     # logits
                pl.BlockSpec((tile_n, 1), lambda i: (i, 0)),     # targets
                pl.BlockSpec((1, c), lambda i: (0, 0)),          # alpha (broadcast block)
            ],
            out_specs=pl.BlockSpec((1, 1, 1), lambda i: (i, 0, 0)),
            compiler_params=compiler_params,
        )(logits, targets_2d, alpha_row)

    # final tiny reduction over num_tiles partial sums (exactly one divide by N)
    return jnp.sum(partial) / n


def _focal_loss_ref(logits, targets, alpha, gamma):
    """Pure-JAX reference mirroring the PyTorch module."""
    logp = jax.nn.log_softmax(logits.astype(jnp.float32), axis=-1)
    ce = -jnp.take_along_axis(logp, targets[:, None], axis=-1)[:, 0]
    pt = jnp.exp(-ce)
    alpha_t = alpha[targets]
    return jnp.mean(alpha_t * (1.0 - pt) ** gamma * ce)


if __name__ == "__main__":
    key = jax.random.PRNGKey(0)
    ks = jax.random.split(key, 8)

    # 1) small demo consistent with the module's default alpha=[1,1,1] (3 classes)
    N, C = 8, 3
    logits = jax.random.normal(ks[0], (N, C), dtype=jnp.float32)
    targets = jax.random.randint(ks[1], (N,), 0, C, dtype=jnp.int32)
    alpha = jnp.array([1.0, 1.0, 1.0], dtype=jnp.float32)
    out = jax.block_until_ready(focal_loss(logits, targets, alpha=alpha, gamma=2.0))
    ref = _focal_loss_ref(logits, targets, alpha, 2.0)
    assert jnp.allclose(out, ref, atol=1e-5, rtol=1e-5), (out, ref)

    # 2) tiled class-major path with a partial last tile (N not a multiple of tile_n)
    N2, C2 = 300, 3
    logits2 = jax.random.normal(ks[2], (N2, C2), dtype=jnp.float32)
    targets2 = jax.random.randint(ks[3], (N2,), 0, C2, dtype=jnp.int32)
    out2 = jax.block_until_ready(
        focal_loss(logits2, targets2, alpha=alpha, gamma=2.0, tile_n=128))
    ref2 = _focal_loss_ref(logits2, targets2, alpha, 2.0)
    assert jnp.allclose(out2, ref2, atol=1e-5, rtol=1e-5), (out2, ref2)

    # 3) row-major path (larger class count), partial last tile, non-uniform alpha
    N3, C3 = 100, 40
    logits3 = jax.random.normal(ks[4], (N3, C3), dtype=jnp.float32)
    targets3 = jax.random.randint(ks[5], (N3,), 0, C3, dtype=jnp.int32)
    alpha3 = jax.random.uniform(ks[6], (C3,), dtype=jnp.float32, minval=0.5, maxval=1.5)
    out3 = jax.block_until_ready(
        focal_loss(logits3, targets3, alpha=alpha3, gamma=2.0, tile_n=32))
    ref3 = _focal_loss_ref(logits3, targets3, alpha3, 2.0)
    assert jnp.allclose(out3, ref3, atol=1e-5, rtol=1e-5), (out3, ref3)

    # 4) bf16 logits, auto tile size (exercises in-kernel upcast + dtype-aware rounding)
    logits4 = jax.random.normal(ks[7], (N2, C2), dtype=jnp.bfloat16)
    out4 = jax.block_until_ready(focal_loss(logits4, targets2, alpha=alpha, gamma=2.0))
    ref4 = _focal_loss_ref(logits4, targets2, alpha, 2.0)
    assert jnp.allclose(out4, ref4, atol=1e-4, rtol=1e-4), (out4, ref4)

    print("KERNEL_OK")
</pallas_src>

<mosaic_0001>
module attributes {stable_mosaic.version = 11 : i64} {
  func.func @_focal_loss_kernel_cmajor(%arg0: i32, %arg1: memref<3x8xf32, #tpu.memory_space<vmem>>, %arg2: memref<1x8xi32, #tpu.memory_space<vmem>>, %arg3: memref<3x1xf32, #tpu.memory_space<vmem>>, %arg4: memref<1x1x1xf32, #tpu.memory_space<vmem>>) attributes {dimension_semantics = [#tpu.dimension_semantics<parallel>], iteration_bounds = array<i64: 1>, scalar_prefetch = 0 : i64, scratch_operands = 0 : i64, tpu.core_type = #tpu.core_type<tc>, window_params = [{transform_indices = @transform_0, window_bounds = array<i64: 3, 8>}, {transform_indices = @transform_1, window_bounds = array<i64: 1, 8>}, {pipeline_mode = #tpu.pipeline_mode<synchronous>, transform_indices = @transform_2, window_bounds = array<i64: 3, 1>}, {transform_indices = @transform_3, window_bounds = array<i64: 1, 1, 1>}]} {
    %0 = tpu.iota {dimensions = array<i32: 1>} : vector<1x8xi32>
    %c8_i32 = arith.constant 8 : i32
    %1 = arith.muli %arg0, %c8_i32 : i32
    %2 = vector.broadcast %1 : i32 to vector<1x8xi32>
    %3 = arith.addi %0, %2 : vector<1x8xi32>
    %c8_i32_0 = arith.constant 8 : i32
    %4 = vector.broadcast %c8_i32_0 : i32 to vector<1x8xi32>
    %5 = arith.cmpi slt, %3, %4 : vector<1x8xi32>
    %c0 = arith.constant 0 : index
    %c0_1 = arith.constant 0 : index
    %6 = vector.load %arg1[%c0, %c0_1] : memref<3x8xf32, #tpu.memory_space<vmem>>, vector<3x8xf32>
    %cst = arith.constant 0.000000e+00 : f32
    %7 = vector.shape_cast %5 : vector<1x8xi1> to vector<1x8xi1>
    %8 = vector.broadcast %7 : vector<1x8xi1> to vector<3x8xi1>
    %9 = vector.broadcast %cst : f32 to vector<3x8xf32>
    %10 = arith.select %8, %6, %9 : vector<3x8xi1>, vector<3x8xf32>
    %c0_2 = arith.constant 0 : index
    %c0_3 = arith.constant 0 : index
    %11 = vector.load %arg2[%c0_2, %c0_3] : memref<1x8xi32, #tpu.memory_space<vmem>>, vector<1x8xi32>
    %c0_4 = arith.constant 0 : index
    %c0_5 = arith.constant 0 : index
    %12 = vector.load %arg3[%c0_4, %c0_5] : memref<3x1xf32, #tpu.memory_space<vmem>>, vector<3x1xf32>
    %cst_6 = arith.constant dense<0xFF800000> : vector<8xf32>
    %13 = vector.multi_reduction <maximumf>, %10, %cst_6 [0] : vector<3x8xf32> to vector<8xf32>
    %14 = vector.shape_cast %13 : vector<8xf32> to vector<1x8xf32>
    %15 = vector.broadcast %14 : vector<1x8xf32> to vector<3x8xf32>
    %16 = arith.subf %10, %15 : vector<3x8xf32>
    %17 = math.exp %16 : vector<3x8xf32>
    %cst_7 = arith.constant dense<0.000000e+00> : vector<8xf32>
    %18 = vector.multi_reduction <add>, %17, %cst_7 [0] : vector<3x8xf32> to vector<8xf32>
    %19 = vector.shape_cast %18 : vector<8xf32> to vector<1x8xf32>
    %20 = math.log %19 : vector<1x8xf32>
    %21 = arith.addf %14, %20 : vector<1x8xf32>
    %22 = tpu.iota {dimensions = array<i32: 0>} : vector<3x8xi32>
    %23 = vector.broadcast %11 : vector<1x8xi32> to vector<3x8xi32>
    %24 = arith.cmpi eq, %22, %23 : vector<3x8xi32>
    %cst_8 = arith.constant 0.000000e+00 : f32
    %25 = vector.broadcast %cst_8 : f32 to vector<3x8xf32>
    %26 = arith.select %24, %10, %25 : vector<3x8xi1>, vector<3x8xf32>
    %cst_9 = arith.constant dense<0.000000e+00> : vector<8xf32>
    %27 = vector.multi_reduction <add>, %26, %cst_9 [0] : vector<3x8xf32> to vector<8xf32>
    %28 = vector.shape_cast %27 : vector<8xf32> to vector<1x8xf32>
    %cst_10 = arith.constant 0.000000e+00 : f32
    %29 = vector.shape_cast %12 : vector<3x1xf32> to vector<3x1xf32>
    %30 = vector.broadcast %29 : vector<3x1xf32> to vector<3x8xf32>
    %31 = vector.broadcast %cst_10 : f32 to vector<3x8xf32>
    %32 = arith.select %24, %30, %31 : vector<3x8xi1>, vector<3x8xf32>
    %cst_11 = arith.constant dense<0.000000e+00> : vector<8xf32>
    %33 = vector.multi_reduction <add>, %32, %cst_11 [0] : vector<3x8xf32> to vector<8xf32>
    %34 = vector.shape_cast %33 : vector<8xf32> to vector<1x8xf32>
    %35 = arith.subf %21, %28 : vector<1x8xf32>
    %cst_12 = arith.constant 0.000000e+00 : f32
    %36 = vector.broadcast %cst_12 : f32 to vector<1x8xf32>
    %37 = arith.subf %36, %35 : vector<1x8xf32>
    %38 = math.exp %37 : vector<1x8xf32>
    %cst_13 = arith.constant 1.000000e+00 : f32
    %39 = vector.broadcast %cst_13 : f32 to vector<1x8xf32>
    %40 = arith.subf %39, %38 : vector<1x8xf32>
    %cst_14 = arith.constant 0.000000e+00 : f32
    %41 = vector.broadcast %cst_14 : f32 to vector<1x8xf32>
    %42 = arith.maximumf %40, %41 : vector<1x8xf32>
    %43 = arith.mulf %42, %42 : vector<1x8xf32>
    %44 = arith.mulf %34, %43 : vector<1x8xf32>
    %45 = arith.mulf %44, %35 : vector<1x8xf32>
    %cst_15 = arith.constant 0.000000e+00 : f32
    %46 = vector.broadcast %cst_15 : f32 to vector<1x8xf32>
    %47 = arith.select %5, %45, %46 : vector<1x8xi1>, vector<1x8xf32>
    %cst_16 = arith.constant dense<0.000000e+00> : vector<1xf32>
    %48 = vector.multi_reduction <add>, %47, %cst_16 [1] : vector<1x8xf32> to vector<1xf32>
    %49 = vector.shape_cast %48 : vector<1xf32> to vector<1x1xf32>
    %c0_17 = arith.constant 0 : index
    %c0_18 = arith.constant 0 : index
    %c0_19 = arith.constant 0 : index
    %50 = vector.load %arg4[%c0_17, %c0_18, %c0_19] : memref<1x1x1xf32, #tpu.memory_space<vmem>>, vector<1x1x1xf32>
    %51 = vector.shape_cast %50 : vector<1x1x1xf32> to vector<1x1xf32>
    %52 = vector.shape_cast %49 : vector<1x1xf32> to vector<1x1x1xf32>
    tpu.vector_store %arg4[%c0_17, %c0_18, %c0_19], %52 {strides = array<i32>} : memref<1x1x1xf32, #tpu.memory_space<vmem>>, vector<1x1x1xf32>,
    return
  }
  func.func @transform_0(%arg0: i32) -> (i32, i32) {
    %c0_i32 = arith.constant 0 : i32
    %c0_i32_0 = arith.constant 0 : i32
    return %c0_i32, %arg0 : i32, i32
  }
  func.func @transform_1(%arg0: i32) -> (i32, i32) {
    %c0_i32 = arith.constant 0 : i32
    %c0_i32_0 = arith.constant 0 : i32
    return %c0_i32, %arg0 : i32, i32
  }
  func.func @transform_2(%arg0: i32) -> (i32, i32) {
    %c0_i32 = arith.constant 0 : i32
    %c0_i32_0 = arith.constant 0 : i32
    %c0_i32_1 = arith.constant 0 : i32
    return %c0_i32, %c0_i32_0 : i32, i32
  }
  func.func @transform_3(%arg0: i32) -> (i32, i32, i32) {
    %c0_i32 = arith.constant 0 : i32
    %c0_i32_0 = arith.constant 0 : i32
    %c0_i32_1 = arith.constant 0 : i32
    return %arg0, %c0_i32, %c0_i32_0 : i32, i32, i32
  }
}

</mosaic_0001>

<bundles_post_ra>
// kernel: tpu_custom_call.1
= control target key start
LH: loop header
LB: loop body
LE: loop exit
PB: predicated region body
PF: predicated region fallthrough
CT: control target
= control target key end

     0   :  { %v15_v1 = vlaneseq  ;;  %v140_v2 = vmov 0   ;;  %s191_s0 = inlined_call_operand.vmem [shape: f32[3,8], index: 0, kind: input, shape index: {}]   ;;  %s192_s1 = inlined_call_operand.vmem [shape: s32[1,8], index: 1, kind: input, shape index: {}]   ;;  %s193_s2 = inlined_call_operand.vmem [shape: f32[3,1], index: 2, kind: input, shape index: {}]   ;;  %s194_s3 = inlined_call_operand.hbm [shape: f32[1,1,1], index: 3, kind: output, shape index: {}]  }
   0x1   :  { %v26_v0 = vld [vmem:[%s193_s2] sm:$0x7]  ;;  %109 = vset.pattern.permute.xlu0 %v140_v2 }
   0x2   :  { %8 = vsyncpa [#allocation3], 0  ;;  %65 = vperm.xlu0 %109, %v26_v0   ;;  %v16_v3 = vand.u32 127, %v15_v1  ;;  %v21_v4 = vld [vmem:[%s191_s0] sm:$0x7]  ;;  %vm27_vm1 = vcmask 59392  }
   0x3   :  { %v49_v20 = vshrl.u32 %v15_v1, 7  ;;  %v106_v21 = vld [vmem:[%s192_s1] ss:$0 sm:$0xff]  ;;  %vm86_vm3 = vcmask 64512   ;;  %s141_s1 = smov [#allocation2]   ;;  %vm90_vm4 = vcmask 0  }
   0x4   :  { %vm20_vm0 = vcmp.lt.s32.totalorder %v16_v3, 8  ;;  %s98_s16 = sshll.u32 %s141_s1, 4  ;;  %s99_s16 = int_to_ptr.vmem [resolvable:$true] %s98_s16 }
   0x5   :  { %v24_v5 = vsel %vm20_vm0, %v21_v4, 0.0  ;;  %vm54_vm2 = vcmp.eq.s32.totalorder %v49_v20, %v106_v21  ;;  %s116_s17 = scalar_lea.vmem %s99_s16, 16  ;;  %s120_s18 = scalar_lea.vmem %s99_s16, 32 }
   0x6   :  { %v28_v6 = vsel %vm27_vm1, %v24_v5, -inf  ;;  %v55_v23 = vsel %vm54_vm2, %v24_v5, 0.0  ;;  %p117_p0 = scmp.ne.s32.totalorder %s99_s16, %s116_s17  ;;  %p121_p1 = scmp.lt.s32.totalorder %s99_s16, %s99_s16 }
   0x7   :  { %v29_v7 = vrot.slane %v28_v6, 4  ;;  %v56_v25 = vsel %vm27_vm1, %v55_v23, 0.0  ;;  %p122_p2 = scmp.lt.s32.totalorder %s120_s18, %s116_s17 }
   0x8   :  { %v57_v27 = vrot.slane %v56_v25, 4 }
   0x9   :  { %v30_v8 = vmax.f32 %v28_v6, %v29_v7  ;;  %p123_p3 = por %p122_p2, %p121_p1 }
   0xa   :  { %v58_v28 = vadd.f32 %v57_v27, %v56_v25 }
   0xb   :  { %v31_v9 = vrot.slane %v30_v8, 2  ;;  %p124_p4 = pnand %p123_p3, %p117_p0 }
   0xc   :  { %v59_v29 = vrot.slane %v58_v28, 2 }
   0xd   :  { %v32_v10 = vmax.f32 %v30_v8, %v31_v9 }
   0xe   :  { %v60_v30 = vadd.f32 %v59_v29, %v58_v28 }
   0xf   :  { %v33_v11 = vrot.slane %v32_v10, 1 }
  0x10   :  { %v61_v32 = vrot.slane %v60_v30, 1 }
  0x11   :  { %v34_v12 = vmax.f32 %v32_v10, %v33_v11 }
  0x12   :  { %v62_v35 = vadd.f32 %v61_v32, %v60_v30 }
  0x13   :  { %v35_v13 = vsub.f32 %v24_v5, %v34_v12 }
  0x15   :  { %v36_v14 = vmul.f32 1.442695, %v35_v13 }
  0x17   :  { %110 = vpow2.f32 %v36_v14 }
  0x21   :  { %v111_v15 = vpop.eup %110 }
  0x22   :  { %v38_v16 = vsel %vm27_vm1, %v111_v15, 0.0 }
  0x23   :  { %v39_v17 = vrot.slane %v38_v16, 4 }
  0x25   :  { %v40_v18 = vadd.f32 %v39_v17, %v38_v16 }
  0x27   :  { %v41_v19 = vrot.slane %v40_v18, 2 }
  0x29   :  { %v42_v22 = vadd.f32 %v41_v19, %v40_v18 }
  0x2b   :  { %v43_v24 = vrot.slane %v42_v22, 1 }
  0x2d   :  { %v44_v26 = vadd.f32 %v43_v24, %v42_v22 }
  0x2f   :  { %112 = vlog2.f32 %v44_v26 }
  0x39   :  { %v113_v31 = vpop.eup %112 }
  0x3a   :  { %v46_v33 = vmul.f32 0.6931472, %v113_v31 }
  0x3c   :  { %v47_v34 = vadd.f32 %v46_v33, %v34_v12 }
  0x3e   :  { %v76_v36 = vsub.f32 %v47_v34, %v62_v35 }
  0x40   :  { %v77_v37 = vsub.f32 0.0, %v76_v36 }
  0x42   :  { %v78_v38 = vmul.f32 1.442695, %v77_v37 }
  0x44   :  { %114 = vpow2.f32 %v78_v38 }
  0x4e   :  { %v115_v39 = vpop.eup %114 }
  0x4f   :  { %v80_v44 = vsub.f32 1.0, %v115_v39 }
  0x51   :  { %v81_v47 = vmax.f32 %v80_v44, 0.0 }
  0x53   :  { %v82_v50 = vmul.f32 %v81_v47, %v81_v47 }
  0x81   :  { %v66_v40 = vpop.permute.xlu0 %65 }
  0x82   :  { %v68_v41 = vsel %vm54_vm2, %v66_v40, 0.0 }
  0x83   :  { %v69_v42 = vsel %vm27_vm1, %v68_v41, 0.0 }
  0x84   :  { %v70_v43 = vrot.slane %v69_v42, 4 }
  0x86   :  { %v71_v45 = vadd.f32 %v70_v43, %v69_v42 }
  0x88   :  { %v72_v46 = vrot.slane %v71_v45, 2 }
  0x8a   :  { %v73_v48 = vadd.f32 %v72_v46, %v71_v45 }
  0x8c   :  { %v74_v49 = vrot.slane %v73_v48, 1 }
  0x8e   :  { %v75_v51 = vadd.f32 %v74_v49, %v73_v48 }
  0x90   :  { %v83_v52 = vmul.f32 %v82_v50, %v75_v51 }
  0x92   :  { %v84_v53 = vmul.f32 %v83_v52, %v76_v36 }
  0x94   :  { %v85_v54 = vsel %vm20_vm0, %v84_v53, 0.0 }
  0x95   :  { %v87_v55 = vsel %vm86_vm3, %v85_v54, 0.0 }
  0x96   :  { %88 = vadd.xlane.f32.xlu0 %v87_v55 }
 0x123   :  { %v89_v56 = vpop.xlane.xlu0 %88 }
 0x124   :  { %91 = vst.msk [vmem:[#allocation2] sm:$0x1] %vm90_vm4, %v89_v56 }
 0x125   :  { %127 = shalt.err (!%p124_p4)
}
 0x126   :  { %s128_s21 = scalar_lea.hbm %s194_s3, 16 }
 0x127   :  { %p129_p5 = scmp.ne.s32.totalorder %s194_s3, %s128_s21  ;;  %p132_p6 = scmp.lt.u32.totalorder %s128_s21, %s194_s3 }
 0x129   :  { %p134_p7 = pnand %p132_p6, %p129_p5 }
 0x12b   :  { %137 = shalt.err (!%p134_p7)
}
 0x12c   :  { %101 = dma.vmem_to_hbm [thread:$0]  %s99_s16, 16, %s194_s3, [#allocation3]  }
 0x12d   :  { %138 = dma.done.wait [#allocation3], 16  }
 0x12e   :  { %139 = vsyncadd [#allocation3], 4294967280 }
 0x12f   :  { %105 = vsyncpa [#allocation3], 1 }

</bundles_post_ra>
